<compile_context>
chip_gen: v6e
topology: v6e:2x2x1
jax: 0.10.0
libtpu: 0.0.40
codegen_flags: <defaults>
</compile_context>

<pallas_src>
import functools
import math

import jax
import jax.numpy as jnp
from jax import lax
from jax.experimental import pallas as pl
from jax.experimental.pallas import tpu as pltpu


# Finite large-negative mask value: avoids any inf - inf -> NaN in the
# online-softmax running-max update; exp(-1e30 - m) underflows to exactly 0.
_MASK_VALUE = -1e30


def _single_buffered(block_shape, index_map):
    """BlockSpec for constant-index blocks: request single buffering.

    Falls back to a plain (double-buffered) BlockSpec if this JAX version
    does not accept pipeline_mode / Buffered(1).
    """
    try:
        return pl.BlockSpec(block_shape, index_map,
                            pipeline_mode=pl.Buffered(1))
    except Exception:  # noqa: BLE001 - graceful degradation only
        return pl.BlockSpec(block_shape, index_map)


# ----------------------------------------------------------------------------
# Kernel 1: QKV projection (column-tiled weights)
# ----------------------------------------------------------------------------
def _qkv_proj_kernel(x_ref, wq_ref, wk_ref, wv_ref, q_ref, k_ref, v_ref):
    x = x_ref[0]                                                   # (TQ, d_in)
    q_ref[0] = jnp.dot(x, wq_ref[...],
                       preferred_element_type=jnp.float32).astype(q_ref.dtype)
    k_ref[0] = jnp.dot(x, wk_ref[...],
                       preferred_element_type=jnp.float32).astype(k_ref.dtype)
    v_ref[0] = jnp.dot(x, wv_ref[...],
                       preferred_element_type=jnp.float32).astype(v_ref.dtype)


# ----------------------------------------------------------------------------
# Kernel 2: flash attention (causal, triangular schedule) + output projection
# ----------------------------------------------------------------------------
def _flash_attn_kernel(qi_tab_ref, ki_tab_ref,
                       q_ref, k_ref, v_ref, wo_ref, bo_ref,
                       o_ref,
                       m_ref, l_ref, acc_ref,
                       *, num_heads: int, head_dim: int, tq: int, tk: int):
    H, hd = num_heads, head_dim
    t = pl.program_id(1)
    qi = qi_tab_ref[t]
    ki = ki_tab_ref[t]
    q_off = qi * tq
    k_off = ki * tk

    @pl.when(ki == 0)
    def _init():
        m_ref[...] = jnp.full(m_ref.shape, _MASK_VALUE, m_ref.dtype)
        l_ref[...] = jnp.zeros(l_ref.shape, l_ref.dtype)
        acc_ref[...] = jnp.zeros(acc_ref.shape, acc_ref.dtype)

    def _make_body(apply_mask: bool):
        def body():
            q = q_ref[0]            # (tq, H*hd), 1/sqrt(hd) already folded in
            k = k_ref[0]            # (tk, H*hd)
            v = v_ref[0]            # (tk, H*hd)
            m_prev = m_ref[...]     # (tq, H) f32
            l_prev = l_ref[...]     # (tq, H) f32
            acc_prev = acc_ref[...]  # (tq, H*hd) f32

            if apply_mask:
                # Built only on diagonal-crossing tiles.
                row = lax.broadcasted_iota(jnp.int32, (tq, tk), 0) + q_off
                col = lax.broadcasted_iota(jnp.int32, (tq, tk), 1) + k_off
                above_diag = col > row

            ones_col = jnp.ones((tk, 1), dtype=v.dtype)
            m_cols, l_cols, acc_cols = [], [], []
            # TODO(synk): for H >= 16 switch to lax.fori_loop(..., unroll=2..4)
            # with pl.ds slices to bound vreg pressure / compile time.
            for h in range(H):
                sl = slice(h * hd, (h + 1) * hd)
                # s = q_h @ k_h^T (contract head_dim; no transposes in memory)
                s = lax.dot_general(q[:, sl], k[:, sl],
                                    (((1,), (1,)), ((), ())),
                                    preferred_element_type=jnp.float32)
                if apply_mask:
                    s = jnp.where(above_diag, _MASK_VALUE, s)
                m_h_prev = m_prev[:, h:h + 1]                         # (tq, 1)
                m_h = jnp.maximum(m_h_prev,
                                  jnp.max(s, axis=-1, keepdims=True))
                alpha = jnp.exp(m_h_prev - m_h)
                p = jnp.exp(s - m_h)                                  # (tq, tk)
                # Fold the p row-sum into the PV matmul via a ones column.
                v_aug = jnp.concatenate([v[:, sl], ones_col], axis=-1)
                pv = jnp.dot(p.astype(v.dtype), v_aug,
                             preferred_element_type=jnp.float32)      # (tq,hd+1)
                m_cols.append(m_h)
                l_cols.append(alpha * l_prev[:, h:h + 1] + pv[:, hd:hd + 1])
                acc_cols.append(alpha * acc_prev[:, sl] + pv[:, :hd])
            # Lane-dense slab stores (one per tile, not H narrow masked stores).
            m_ref[...] = jnp.concatenate(m_cols, axis=-1)
            l_ref[...] = jnp.concatenate(l_cols, axis=-1)
            acc_ref[...] = jnp.concatenate(acc_cols, axis=-1)
        return body

    # Every (qi, ki) in the triangular schedule has visible keys, so compute
    # always runs; only the masking work is conditional.
    needs_mask = (k_off + (tk - 1)) > q_off
    pl.when(needs_mask)(_make_body(True))
    pl.when(jnp.logical_not(needs_mask))(_make_body(False))

    is_last = (k_off + tk) >= (q_off + tq)

    @pl.when(is_last)
    def _finalize():
        # Per-head softmax normalization via the (nearly free) EUP reciprocal.
        inv_l = pl.reciprocal(l_ref[...], approx=True)                # (tq, H)
        ctx_cols = [acc_ref[:, h * hd:(h + 1) * hd] * inv_l[:, h:h + 1]
                    for h in range(H)]
        ctx = jnp.concatenate(ctx_cols, axis=-1).astype(wo_ref.dtype)
        # Fused output projection (+ bias, like torch.nn.Linear default).
        out = jnp.dot(ctx, wo_ref[...],
                      preferred_element_type=jnp.float32) + bo_ref[...]
        o_ref[0] = out.astype(o_ref.dtype)


# ----------------------------------------------------------------------------
# Wrapper
# ----------------------------------------------------------------------------
def _pick_tile(n: int, cap: int = 256) -> int:
    for t in (cap, 512, 256, 128, 64, 32, 16, 8):
        if t <= n and n % t == 0:
            return t
    return n


def multi_head_attention(x, w_query, w_key, w_value, w_out, b_out,
                         *, num_heads: int,
                         compute_dtype=jnp.bfloat16,
                         out_dtype=None,
                         tq: int | None = None, tk: int | None = None):
    """x: (B, T, d_in); weights pre-transposed to (in, out); bias b_out: (d_out,)."""
    B, T, d_in = x.shape
    d_out = w_query.shape[1]
    assert d_out % num_heads == 0
    head_dim = d_out // num_heads

    TQ = tq or _pick_tile(T)
    TK = tk or _pick_tile(T)
    assert T % TQ == 0 and T % TK == 0
    # Output dtype: keep module parity (x.dtype) by default; pass bf16 to
    # halve writeback bandwidth if the surrounding model tolerates it.
    out_dtype = out_dtype or x.dtype

    # Fold the 1/sqrt(head_dim) softmax scale into the Q weights (zero cost).
    scale = 1.0 / math.sqrt(head_dim)
    xc = x.astype(compute_dtype)
    wq_c = (w_query * scale).astype(compute_dtype)
    wk_c = w_key.astype(compute_dtype)
    wv_c = w_value.astype(compute_dtype)
    wo_c = w_out.astype(compute_dtype)
    bo_2d = b_out.reshape(1, d_out).astype(jnp.float32)

    # ---- Kernel 1: QKV projection, column-tiled weights ----------------------
    TN = _pick_tile(d_out, cap=512)
    q, k, v = pl.pallas_call(
        _qkv_proj_kernel,
        out_shape=[jax.ShapeDtypeStruct((B, T, d_out), compute_dtype)] * 3,
        grid_spec=pltpu.PrefetchScalarGridSpec(
            num_scalar_prefetch=0,
            grid=(B, T // TQ, d_out // TN),
            in_specs=[
                pl.BlockSpec((1, TQ, d_in), lambda b, i, n: (b, i, 0)),   # x
                pl.BlockSpec((d_in, TN), lambda b, i, n: (0, n)),         # Wq
                pl.BlockSpec((d_in, TN), lambda b, i, n: (0, n)),         # Wk
                pl.BlockSpec((d_in, TN), lambda b, i, n: (0, n)),         # Wv
            ],
            out_specs=[pl.BlockSpec((1, TQ, TN), lambda b, i, n: (b, i, n))] * 3,
        ),
        compiler_params=pltpu.CompilerParams(
            dimension_semantics=("parallel", "parallel", "parallel")),
    )(xc, wq_c, wk_c, wv_c)

    # ---- Kernel 2: flash attention (triangular schedule) + out projection ----
    # Flatten the lower-triangular (q-tile, kv-tile) space: above-diagonal KV
    # tiles are never DMA'd and never pay a grid step.
    nq = T // TQ
    qi_list, ki_list = [], []
    for qi in range(nq):
        last_ki = ((qi + 1) * TQ - 1) // TK
        for ki in range(last_ki + 1):
            qi_list.append(qi)
            ki_list.append(ki)
    qi_tab = jnp.asarray(qi_list, jnp.int32)
    ki_tab = jnp.asarray(ki_list, jnp.int32)
    num_steps = len(qi_list)

    # Rough VMEM budget (double-buffered q/k/v/out blocks + weights + scratch),
    # clamped so it also respects v7x's 64 MiB physical VMEM.
    itemsize = jnp.dtype(compute_dtype).itemsize
    est = (2 * (2 * TQ + 2 * TK) * d_out * itemsize        # q, k, v, out blocks
           + d_out * d_out * itemsize + d_out * 4          # W_out + b_out
           + (2 * TQ * num_heads + TQ * d_out) * 4)        # m, l, acc scratch
    vmem_limit = int(min(max(3 * est, 16 << 20), 64 << 20))

    flash_kernel = functools.partial(_flash_attn_kernel,
                                     num_heads=num_heads, head_dim=head_dim,
                                     tq=TQ, tk=TK)
    out = pl.pallas_call(
        flash_kernel,
        out_shape=jax.ShapeDtypeStruct((B, T, d_out), out_dtype),
        grid_spec=pltpu.PrefetchScalarGridSpec(
            num_scalar_prefetch=2,
            grid=(B, num_steps),
            in_specs=[
                pl.BlockSpec((1, TQ, d_out), lambda b, t, qt, kt: (b, qt[t], 0)),  # Q
                pl.BlockSpec((1, TK, d_out), lambda b, t, qt, kt: (b, kt[t], 0)),  # K
                pl.BlockSpec((1, TK, d_out), lambda b, t, qt, kt: (b, kt[t], 0)),  # V
                _single_buffered((d_out, d_out), lambda b, t, qt, kt: (0, 0)),     # W_out
                _single_buffered((1, d_out), lambda b, t, qt, kt: (0, 0)),         # b_out
            ],
            out_specs=pl.BlockSpec((1, TQ, d_out),
                                   lambda b, t, qt, kt: (b, qt[t], 0)),
            scratch_shapes=[
                pltpu.VMEM((TQ, num_heads), jnp.float32),   # running max m
                pltpu.VMEM((TQ, num_heads), jnp.float32),   # running sum l
                pltpu.VMEM((TQ, d_out), jnp.float32),       # context accumulator
            ],
        ),
        compiler_params=pltpu.CompilerParams(
            dimension_semantics=("parallel", "arbitrary"),
            vmem_limit_bytes=vmem_limit),
    )(qi_tab, ki_tab, q, k, v, wo_c, bo_2d)
    return out


# ----------------------------------------------------------------------------
# Pure-JAX reference (mirrors the PyTorch forward, eval mode)
# ----------------------------------------------------------------------------
def _reference(x, wq, wk, wv, wo, bo, num_heads):
    B, T, d_in = x.shape
    d_out = wq.shape[1]
    hd = d_out // num_heads
    q = (x @ wq).reshape(B, T, num_heads, hd).transpose(0, 2, 1, 3)
    k = (x @ wk).reshape(B, T, num_heads, hd).transpose(0, 2, 1, 3)
    v = (x @ wv).reshape(B, T, num_heads, hd).transpose(0, 2, 1, 3)
    scores = jnp.einsum('bhtd,bhsd->bhts', q, k)
    mask = jnp.triu(jnp.ones((T, T), bool), k=1)
    scores = jnp.where(mask[None, None], -jnp.inf, scores)
    w = jax.nn.softmax(scores / math.sqrt(hd), axis=-1)
    # TODO(synk): dropout on attention weights is identity (eval semantics);
    # training-mode torch dropout RNG has no exact JAX/Pallas equivalent.
    ctx = jnp.einsum('bhts,bhsd->bhtd', w, v).transpose(0, 2, 1, 3)
    ctx = ctx.reshape(B, T, d_out)
    return ctx @ wo + bo


if __name__ == "__main__":
    # Small shapes consistent with the module's forward signature.
    batch_size = 2        # even -> both v7x TensorCores get a shard
    num_tokens = 16       # == context_length; tq=tk=8 exercises the triangle
    d_in = 32
    d_out = 32
    num_heads = 4

    key = jax.random.PRNGKey(0)
    kx, kq, kk, kv, ko, kb = jax.random.split(key, 6)

    x = jax.random.normal(kx, (batch_size, num_tokens, d_in), jnp.float32)

    # Deterministic parameter init (scaled like torch Linear uniform bounds).
    s_in = 1.0 / math.sqrt(d_in)
    s_out = 1.0 / math.sqrt(d_out)
    w_query = jax.random.uniform(kq, (d_in, d_out), jnp.float32, -s_in, s_in)
    w_key   = jax.random.uniform(kk, (d_in, d_out), jnp.float32, -s_in, s_in)
    w_value = jax.random.uniform(kv, (d_in, d_out), jnp.float32, -s_in, s_in)
    w_out   = jax.random.uniform(ko, (d_out, d_out), jnp.float32, -s_out, s_out)
    b_out   = jax.random.uniform(kb, (d_out,), jnp.float32, -s_out, s_out)

    out = multi_head_attention(x, w_query, w_key, w_value, w_out, b_out,
                               num_heads=num_heads, tq=8, tk=8)
    out = jax.block_until_ready(out)

    ref = _reference(x, w_query, w_key, w_value, w_out, b_out, num_heads)
    assert out.shape == (batch_size, num_tokens, d_out)
    # bf16 activations with f32 accumulation + approx reciprocal -> loose tol.
    err = float(jnp.max(jnp.abs(out.astype(jnp.float32) - ref)))
    assert err < 5e-2, f"mismatch vs reference (max abs err {err})"

    print("KERNEL_OK")
</pallas_src>

<mosaic_0001>
module attributes {stable_mosaic.version = 11 : i64} {
  func.func @_qkv_proj_kernel(%arg0: i32, %arg1: i32, %arg2: i32, %arg3: memref<1x8x32xbf16, #tpu.memory_space<vmem>>, %arg4: memref<32x32xbf16, #tpu.memory_space<vmem>>, %arg5: memref<32x32xbf16, #tpu.memory_space<vmem>>, %arg6: memref<32x32xbf16, #tpu.memory_space<vmem>>, %arg7: memref<1x8x32xbf16, #tpu.memory_space<vmem>>, %arg8: memref<1x8x32xbf16, #tpu.memory_space<vmem>>, %arg9: memref<1x8x32xbf16, #tpu.memory_space<vmem>>) attributes {dimension_semantics = [#tpu.dimension_semantics<parallel>, #tpu.dimension_semantics<parallel>, #tpu.dimension_semantics<parallel>], iteration_bounds = array<i64: 2, 2, 1>, scalar_prefetch = 0 : i64, scratch_operands = 0 : i64, tpu.core_type = #tpu.core_type<tc>, window_params = [{transform_indices = @transform_0, window_bounds = array<i64: 1, 8, 32>}, {transform_indices = @transform_1, window_bounds = array<i64: 32, 32>}, {transform_indices = @transform_2, window_bounds = array<i64: 32, 32>}, {transform_indices = @transform_3, window_bounds = array<i64: 32, 32>}, {transform_indices = @transform_4, window_bounds = array<i64: 1, 8, 32>}, {transform_indices = @transform_5, window_bounds = array<i64: 1, 8, 32>}, {transform_indices = @transform_6, window_bounds = array<i64: 1, 8, 32>}]} {
    %c0 = arith.constant 0 : index
    %c0_0 = arith.constant 0 : index
    %c0_1 = arith.constant 0 : index
    %0 = vector.load %arg3[%c0, %c0_0, %c0_1] : memref<1x8x32xbf16, #tpu.memory_space<vmem>>, vector<1x8x32xbf16>
    %1 = vector.shape_cast %0 : vector<1x8x32xbf16> to vector<8x32xbf16>
    %c0_2 = arith.constant 0 : index
    %c0_3 = arith.constant 0 : index
    %2 = vector.load %arg4[%c0_2, %c0_3] : memref<32x32xbf16, #tpu.memory_space<vmem>>, vector<32x32xbf16>
    %cst = arith.constant dense<0.000000e+00> : vector<8x32xf32>
    %3 = tpu.matmul %1, %2, %cst {dimension_numbers = #tpu.dot_dimension_numbers<[1], [0], [0], [1], [0, 0, 1, 1], [], []>} : vector<8x32xbf16>, vector<32x32xbf16>, vector<8x32xf32> -> vector<8x32xf32>
    %4 = arith.truncf %3 : vector<8x32xf32> to vector<8x32xbf16>
    %c0_4 = arith.constant 0 : index
    %c0_5 = arith.constant 0 : index
    %c0_6 = arith.constant 0 : index
    %5 = vector.load %arg7[%c0_4, %c0_5, %c0_6] : memref<1x8x32xbf16, #tpu.memory_space<vmem>>, vector<1x8x32xbf16>
    %6 = vector.shape_cast %5 : vector<1x8x32xbf16> to vector<8x32xbf16>
    %7 = vector.shape_cast %4 : vector<8x32xbf16> to vector<1x8x32xbf16>
    tpu.vector_store %arg7[%c0_4, %c0_5, %c0_6], %7 {strides = array<i32>} : memref<1x8x32xbf16, #tpu.memory_space<vmem>>, vector<1x8x32xbf16>,
    %c0_7 = arith.constant 0 : index
    %c0_8 = arith.constant 0 : index
    %8 = vector.load %arg5[%c0_7, %c0_8] : memref<32x32xbf16, #tpu.memory_space<vmem>>, vector<32x32xbf16>
    %cst_9 = arith.constant dense<0.000000e+00> : vector<8x32xf32>
    %9 = tpu.matmul %1, %8, %cst_9 {dimension_numbers = #tpu.dot_dimension_numbers<[1], [0], [0], [1], [0, 0, 1, 1], [], []>} : vector<8x32xbf16>, vector<32x32xbf16>, vector<8x32xf32> -> vector<8x32xf32>
    %10 = arith.truncf %9 : vector<8x32xf32> to vector<8x32xbf16>
    %c0_10 = arith.constant 0 : index
    %c0_11 = arith.constant 0 : index
    %c0_12 = arith.constant 0 : index
    %11 = vector.load %arg8[%c0_10, %c0_11, %c0_12] : memref<1x8x32xbf16, #tpu.memory_space<vmem>>, vector<1x8x32xbf16>
    %12 = vector.shape_cast %11 : vector<1x8x32xbf16> to vector<8x32xbf16>
    %13 = vector.shape_cast %10 : vector<8x32xbf16> to vector<1x8x32xbf16>
    tpu.vector_store %arg8[%c0_10, %c0_11, %c0_12], %13 {strides = array<i32>} : memref<1x8x32xbf16, #tpu.memory_space<vmem>>, vector<1x8x32xbf16>,
    %c0_13 = arith.constant 0 : index
    %c0_14 = arith.constant 0 : index
    %14 = vector.load %arg6[%c0_13, %c0_14] : memref<32x32xbf16, #tpu.memory_space<vmem>>, vector<32x32xbf16>
    %cst_15 = arith.constant dense<0.000000e+00> : vector<8x32xf32>
    %15 = tpu.matmul %1, %14, %cst_15 {dimension_numbers = #tpu.dot_dimension_numbers<[1], [0], [0], [1], [0, 0, 1, 1], [], []>} : vector<8x32xbf16>, vector<32x32xbf16>, vector<8x32xf32> -> vector<8x32xf32>
    %16 = arith.truncf %15 : vector<8x32xf32> to vector<8x32xbf16>
    %c0_16 = arith.constant 0 : index
    %c0_17 = arith.constant 0 : index
    %c0_18 = arith.constant 0 : index
    %17 = vector.load %arg9[%c0_16, %c0_17, %c0_18] : memref<1x8x32xbf16, #tpu.memory_space<vmem>>, vector<1x8x32xbf16>
    %18 = vector.shape_cast %17 : vector<1x8x32xbf16> to vector<8x32xbf16>
    %19 = vector.shape_cast %16 : vector<8x32xbf16> to vector<1x8x32xbf16>
    tpu.vector_store %arg9[%c0_16, %c0_17, %c0_18], %19 {strides = array<i32>} : memref<1x8x32xbf16, #tpu.memory_space<vmem>>, vector<1x8x32xbf16>,
    return
  }
  func.func @transform_0(%arg0: i32, %arg1: i32, %arg2: i32) -> (i32, i32, i32) {
    %c0_i32 = arith.constant 0 : i32
    %c0_i32_0 = arith.constant 0 : i32
    return %arg0, %arg1, %c0_i32 : i32, i32, i32
  }
  func.func @transform_1(%arg0: i32, %arg1: i32, %arg2: i32) -> (i32, i32) {
    %c0_i32 = arith.constant 0 : i32
    %c0_i32_0 = arith.constant 0 : i32
    return %c0_i32, %arg2 : i32, i32
  }
  func.func @transform_2(%arg0: i32, %arg1: i32, %arg2: i32) -> (i32, i32) {
    %c0_i32 = arith.constant 0 : i32
    %c0_i32_0 = arith.constant 0 : i32
    return %c0_i32, %arg2 : i32, i32
  }
  func.func @transform_3(%arg0: i32, %arg1: i32, %arg2: i32) -> (i32, i32) {
    %c0_i32 = arith.constant 0 : i32
    %c0_i32_0 = arith.constant 0 : i32
    return %c0_i32, %arg2 : i32, i32
  }
  func.func @transform_4(%arg0: i32, %arg1: i32, %arg2: i32) -> (i32, i32, i32) {
    %c0_i32 = arith.constant 0 : i32
    return %arg0, %arg1, %arg2 : i32, i32, i32
  }
  func.func @transform_5(%arg0: i32, %arg1: i32, %arg2: i32) -> (i32, i32, i32) {
    %c0_i32 = arith.constant 0 : i32
    return %arg0, %arg1, %arg2 : i32, i32, i32
  }
  func.func @transform_6(%arg0: i32, %arg1: i32, %arg2: i32) -> (i32, i32, i32) {
    %c0_i32 = arith.constant 0 : i32
    return %arg0, %arg1, %arg2 : i32, i32, i32
  }
}

</mosaic_0001>

<bundles_post_ra>
// kernel: tpu_custom_call.1
= control target key start
LH: loop header
LB: loop body
LE: loop exit
PB: predicated region body
PF: predicated region fallthrough
CT: control target
= control target key end

     0   :  { %s1628_s0 = inlined_call_operand.hbm [shape: bf16[2,16,32], index: 0, kind: input, shape index: {}]   ;;  %s1629_s1 = inlined_call_operand.hbm [shape: bf16[32,32], index: 1, kind: input, shape index: {}]   ;;  %s1630_s2 = inlined_call_operand.hbm [shape: bf16[32,32], index: 2, kind: input, shape index: {}]   ;;  %s1631_s3 = inlined_call_operand.hbm [shape: bf16[32,32], index: 3, kind: input, shape index: {}]   ;;  %s1632_s4 = inlined_call_operand.hbm [shape: bf16[2,16,32], index: 4, kind: output, shape index: {0}]   ;;  %s1633_s5 = inlined_call_operand.hbm [shape: bf16[2,16,32], index: 5, kind: output, shape index: {1}]   ;;  %s1634_s6 = inlined_call_operand.hbm [shape: bf16[2,16,32], index: 6, kind: output, shape index: {2}]  }
   0x1   :  { %1643 = sst [smem:[#allocation22_spill]] %s1629_s1 }
   0x2   :  { %1644 = sst [smem:[#allocation23_spill]] %s1630_s2 }
   0x3   :  { %1645 = sst [smem:[#allocation24_spill]] %s1631_s3 }
   0x4   :  { %1646 = sst [smem:[#allocation25_spill]] %s1633_s5 }
   0x5   :  { %1647 = sst [smem:[#allocation26_spill]] %s1634_s6 }
   0x6   :  { %12 = vsyncpa [#allocation3], 0 }
   0x7   :  { %14 = vsyncpa [#allocation3 + $0x1], 0 }
   0x8   :  { %15 = vsyncpa [#allocation6], 0 }
   0x9   :  { %16 = vsyncpa [#allocation9], 0 }
   0xa   :  { %17 = vsyncpa [#allocation4], 0 }
   0xb   :  { %19 = vsyncpa [#allocation4 + $0x1], 0 }
   0xc   :  { %20 = vsyncpa [#allocation12], 0 }
   0xd   :  { %22 = vsyncpa [#allocation12 + $0x1], 0  ;;  %s1330_s21 = smov 0   ;;  %s1332_s22 = smov 0  }
   0xe   :  { %s1334_s23 = smov 0   ;;  %s1336_s24 = smov 0  }
   0xf   :  { %s1338_s25 = smov 0   ;;  %s1340_s26 = smov 0  }
  0x10   :  { %s1342_s27 = smov 0   ;;  %s1344_s28 = smov 0  }
  0x11 LB: > { %1648 = sst [smem:[#allocation19_spill]] %s1254_s21  ;;  %s1371_s29 = sadd.s32 4294967295, %s1282_s28   ;;  %s1282_s28 = sphi %s1344_s28, %s28_s28   ;;  %s1278_s27 = sphi %s1342_s27, %s1681_s27   ;;  %s1274_s26 = sphi %s1340_s26, %s1680_s26   ;;  %s1270_s25 = sphi %s1338_s25, %s1679_s25   ;;  %s1266_s24 = sphi %s1336_s24, %s1678_s24   ;;  %s1262_s23 = sphi %s1334_s23, %s1677_s23   ;;  %s1258_s22 = sphi %s1332_s22, %s1676_s22   ;;  %s1254_s21 = sphi %s1330_s21, %s1675_s21  }
  0x12   : > { %s1637_s30 = sadd.s32 4294967294, %s1282_s28   ;;  %p69_p0 = scmp.ne.s32.totalorder %s1258_s22, %s1254_s21 }
  0x13   : > { %p1635_p1 = scmp.eq.s32.totalorder %s1371_s29, 0  ;;  %p181_p3 = scmp.eq.s32.totalorder %s1637_s30, 3 }
  0x14   : > { %p818_p5 = scmp.ge.s32.totalorder %s1282_s28, 1  ;;  %p248_p7 = scmp.lt.s32.totalorder %s1282_s28, 5 }
  0x15   : > { %p1382_p4 = por %p1635_p1, %p69_p0  ;;  %p1387_p6 = por %p181_p3, %p69_p0 }
  0x16   : > { %p1392_p8 = pnand %p818_p5, %p248_p7  ;;  %s1284_s10 = smov [#allocation5]  }
  0x17   : > { %s1649_s7 = scalar_select %p1382_p4, 1, 0 }
  0x18   : > { %s1650_s8 = scalar_select %p1387_p6, 1, 0 }
  0x19   : > { %s262_s11 = sshll.u32 %s1284_s10, 4  ;;  %p907_p9 = pneg %p1392_p8  ;;  %s263_s11 = int_to_ptr.vmem [resolvable:$true] %s262_s11 }
  0x1a   : > { %1651 = sst [smem:[#allocation20_spill]] %s1650_s8  ;;  %s1285_s13 = smov [#allocation7]  }
  0x1b   : > { %p1400_p10 = pnand %p907_p9, %p1635_p1  ;;  %s277_s14 = sshll.u32 %s1285_s13, 4  ;;  %s278_s14 = int_to_ptr.vmem [resolvable:$true] %s277_s14 }
  0x1c   : > { %s1286_s15 = smov [#allocation8]   ;;  %s1027_s17 = scalar_lea.vmem %s263_s11, 256 }
  0x1d   : > { %s292_s16 = sshll.u32 %s1286_s15, 4  ;;  %p1018_p11 = pneg %p1400_p10  ;;  %s293_s16 = int_to_ptr.vmem [resolvable:$true] %s292_s16 }
  0x1e   : > { %p1028_p12 = scmp.ne.s32.totalorder %s263_s11, %s1027_s17  ;;  %p1035_p3 = scmp.lt.s32.totalorder %s263_s11, %s263_s11 }
  0x1f   : > { %p1036_p5 = scmp.lt.s32.totalorder %s1027_s17, %s1027_s17 }
  0x20   : > { %p1030_p13 = pnand %p1028_p12, %p1018_p11 }
  0x21   : > { %p1037_p7 = por %p1036_p5, %p1035_p3 }
  0x22   : > { %p1031_p0 = pneg %p1030_p13 }
  0x24   : > { %p1038_p9 = pnand %p1037_p7, %p1031_p0 }
  0x26   : > { %1041 = shalt.err (!%p1038_p9)
}
  0x27   : > { %s1287_s18 = smov 64   ;;  %s1288_s19 = smov 4  }
  0x28   : > { %s1654_s1 = sld [smem:[#allocation22_spill]]  ;;  %s1053_s13 = scalar_lea.vmem %s278_s14, 256 }
  0x29   : > { %p1054_p1 = scmp.ne.s32.totalorder %s278_s14, %s1053_s13  ;;  %p1061_p2 = scmp.lt.s32.totalorder %s278_s14, %s278_s14 }
  0x2a   : > { %p1062_p6 = scmp.lt.s32.totalorder %s1053_s13, %s1053_s13 }
  0x2b   : > { %p1056_p12 = pnand %p1054_p1, %p1018_p11 }
  0x2c   : > { %p1063_p3 = por %p1062_p6, %p1061_p2 }
  0x2d   : > { %p1057_p13 = pneg %p1056_p12 }
  0x2e   : > { %910 = dma.hbm_to_vmem [thread:$0]  (!%p1400_p10), %s1654_s1, 256, %s263_s11, [#allocation6], %s1287_s18, %s1287_s18, %s1288_s19  }
  0x2f   : > { %p1064_p0 = pnand %p1063_p3, %p1057_p13 }
  0x31   : > { %1067 = shalt.err (!%p1064_p0)
}
  0x32   : > { %s1655_s2 = sld [smem:[#allocation23_spill]]  ;;  %s1079_s11 = scalar_lea.vmem %s293_s16, 256 }
  0x33   : > { %p1080_p5 = scmp.ne.s32.totalorder %s293_s16, %s1079_s11  ;;  %p1087_p9 = scmp.lt.s32.totalorder %s293_s16, %s293_s16 }
  0x34   : > { %p1088_p12 = scmp.lt.s32.totalorder %s1079_s11, %s1079_s11 }
  0x35   : > { %p1082_p7 = pnand %p1080_p5, %p1018_p11 }
  0x36   : > { %p1089_p4 = por %p1088_p12, %p1087_p9 }
  0x37   : > { %p1083_p1 = pneg %p1082_p7 }
  0x38   : > { %913 = dma.hbm_to_vmem [thread:$0]  (!%p1400_p10), %s1655_s2, 256, %s278_s14, [#allocation6], %s1287_s18, %s1287_s18, %s1288_s19  }
  0x39   : > { %p1090_p2 = pnand %p1089_p4, %p1083_p1 }
  0x3b   : > { %1093 = shalt.err (!%p1090_p2)
}
  0x3c   : > { %s1656_s3 = sld [smem:[#allocation24_spill]]  ;;  %s43_s14 = sadd.s32 1, %s1274_s26 }
  0x3d   : > { %p45_p4 = scmp.ge.s32.totalorder %s43_s14, 2  ;;  %s47_s12 = sadd.s32 1, %s1278_s27 }
  0x3e   : > { %s56_s13 = sadd.s32 1, %s1262_s23  ;;  %p63_p6 = scmp.ne.s32.totalorder %s1262_s23, %s1258_s22 }
  0x3f   : > { %s1683_s14 = smov (%p45_p4, %s43_s14), 0  ;;  %s1685_s12 = smov (!%p45_p4, %s47_s12), %s1278_s27 }
  0x40   : > { %1657 = sst [smem:[#allocation21_spill]] %s1683_s14  ;;  %s52_s15 = ssub.s32 %s1274_s26, %s1683_s14 }
  0x41   : > { %p64_p11 = scmp.eq.s32.totalorder %s1282_s28, 0  ;;  %p49_p13 = scmp.ge.s32.totalorder %s1685_s12, 2 }
  0x42   : > { %916 = dma.hbm_to_vmem [thread:$0]  (!%p1400_p10), %s1656_s3, 256, %s293_s16, [#allocation9], %s1287_s18, %s1287_s18, %s1288_s19  }
  0x43   : > { %p1658_p3 = scmp.eq.s32.totalorder %s1371_s29, 3  ;;  %p1447_p10 = por %p64_p11, %p63_p6 }
  0x44   : > { %p934_p5 = scmp.lt.s32.totalorder %s1282_s28, 4  ;;  %s1687_s12 = smov (%p49_p13, %s1685_s12), 0 }
  0x45   : > { %p1443_p0 = por %p1658_p3, %p63_p6  ;;  %s306_s18 = sand.u32 1, %s1262_s23  }
  0x46   : > { %s824_s19 = sshll.u32 %s1278_s27, 1  ;;  %s51_s11 = ssub.s32 %s1278_s27, %s1687_s12 }
  0x47   : > { %s53_s20 = sor.u32 %s52_s15, %s51_s11  ;;  %s823_s10 = sshll.u32 %s306_s18, 2 }
  0x48   : > { %p54_p7 = scmp.eq.s32.totalorder %s53_s20, 0  ;;  %s315_s30 = sadd.s32 %s1274_s26, %s824_s19 }
  0x49   : > { %s310_s1 = scalar_lea.vmem [#allocation2], %s823_s10  ;;  %s825_s14 = sshll.u32 %s315_s30, 6 }
  0x4a   : > { %s319_s2 = sshll.u32 %s310_s1, 4  ;;  %s317_s6 = scalar_lea.hbm %s1628_s0, %s825_s14  ;;  %s320_s2 = int_to_ptr.vmem [resolvable:$true] %s319_s2 }
  0x4b   : > { %s1460_s3 = scalar_select %p54_p7, %s1262_s23, %s56_s13  }
  0x4c   : > { %p1469_p1 = pnand %p934_p5, %p1447_p10  ;;  %s307_s15 = scalar_lea.sflag [#allocation3], %s306_s18 }
  0x4d   : > { %s1107_s19 = scalar_lea.vmem %s320_s2, 64  ;;  %s1289_s1 = smov [#allocation2]  }
  0x4e   : > { %p1096_p9 = pneg %p1469_p1  ;;  %p1108_p12 = scmp.ne.s32.totalorder %s320_s2, %s1107_s19 }
  0x4f   : > { %s1112_s30 = sshll.u32 %s1289_s1, 4  ;;  %s1113_s30 = int_to_ptr.vmem [resolvable:$false] %s1112_s30 }
  0x50   : > { %p1110_p2 = pnand %p1108_p12, %p1096_p9  ;;  %s1114_s13 = scalar_lea.vmem %s1113_s30, 128 }
  0x51   : > { %p1115_p6 = scmp.lt.s32.totalorder %s320_s2, %s1113_s30  ;;  %p1116_p11 = scmp.lt.s32.totalorder %s1114_s13, %s1107_s19 }
  0x52   : > { %p1111_p4 = pneg %p1110_p2 }
  0x53   : > { %p1117_p13 = por %p1116_p11, %p1115_p6 }
  0x55   : > { %p1118_p3 = pnand %p1117_p13, %p1111_p4 }
  0x57   : > { %1121 = shalt.err (!%p1118_p3)
}
  0x58   : > { %920 = dma.hbm_to_vmem [thread:$0]  (!%p1469_p1), %s317_s6, 64, %s320_s2, %s307_s15  }
  0x59   : > { %328 = sbr.rel (%p1392_p8) target bundleno = 365 (0x16d), region = 36  ;;  %s1480_s21 = sand.u32 (!%p1392_p8), 1, %s1258_s22  }
  0x5a   : > { %s1483_s8 = sshll.u32 (!%p1392_p8), %s1480_s21, 2  ;;  %s331_s14 = scalar_lea.sflag (!%p1392_p8), [#allocation3], %s1480_s21 }
  0x5b   : > { %s334_s16 = scalar_lea.vmem (!%p1392_p8), [#allocation2], %s1483_s8  ;;  %p1662_p10 = scmp.ne.s32.totalorder (!%p1392_p8), %s1649_s7, 0 }
  0x5e   : > { %1233 = dma.done.wait (%p1662_p10), %s331_s14, 64  }
  0x5f   : > { %1235 = vsyncadd (%p1662_p10), %s331_s14, 4294967232  ;;  %p1663_p5 = scmp.eq.s32.totalorder %s1371_s29, 0 }
  0x61   : > { %1237 = dma.done.wait (%p1663_p5), [#allocation6], 512   ;;  %p1664_p8 = pmov %p1663_p5 }
  0x62   : > { %p1665_p7 = pmov %p1663_p5 }
  0x63   : > { %1239 = vsyncadd (%p1664_p8), [#allocation6], 4294966784 }
  0x64   : > { %1241 = dma.done.wait (%p1665_p7), [#allocation9], 256   ;;  %p1666_p1 = pmov %p1663_p5 }
  0x65   : > { %v1290_v0 = vmov 0.0   ;;  %vm1291_vm0 = vmmov 0   ;;  %v1010_v1 = vld [vmem:[#allocation5 + $0x8] sm:$0xff]   ;;  %v1011_v2 = vld [vmem:[#allocation7 + $0x8] sm:$0xff]   ;;  %v1012_v3 = vld [vmem:[#allocation5] sm:$0xff]   ;;  %vm403_vm1 = vcmask 261120  }
  0x66   : > { %1243 = vsyncadd (%p1666_p1), [#allocation9], 4294967040  ;;  %863 = vmatprep.subr.bf16.mxu0 %v1290_v0  ;;  %871 = vmatprep.subr.bf16.mxu1 %v1290_v0  ;;  %v1013_v4 = vld [vmem:[#allocation7] sm:$0xff]   ;;  %v386_v5 = vld [vmem:[%s334_s16] sm:$0xf]  ;;  %s846_s2 = sshll.u32 %s1270_s25, 1 }
  0x67   : > { %867 = vmatprep.mubr.msk.bf16.mxu0 %vm1291_vm0, %v1290_v0  ;;  %875 = vmatprep.mubr.msk.bf16.mxu1 %vm1291_vm0, %v1290_v0  ;;  %v1014_v6 = vld [vmem:[#allocation8 + $0x8] sm:$0xff]   ;;  %v1015_v7 = vld [vmem:[#allocation8] sm:$0xff]   ;;  %s589_s5 = sadd.s32 %s1266_s24, %s846_s2  ;;  %s571_s6 = sand.u32 1, %s1371_s29   ;;  %vm448_vm2 = vcmask 257024  }
  0x68   : > { %864 = vmatpush3.bf16.msra.mxu0 %v1010_v1  ;;  %872 = vmatpush3.bf16.msra.mxu1 %v1011_v2  ;;  %s1505_s7 = sshll.u32 %s589_s5, 6  ;;  %s370_s9 = scalar_lea.vmem [#allocation10], %s1483_s8 }
  0x69   : > { %865 = vmatprep.subr.bf16.mxu0 %v1290_v0  ;;  %873 = vmatprep.subr.bf16.mxu1 %v1290_v0  ;;  %s593_s18 = sshll.u32 %s370_s9, 4  ;;  %s377_s11 = scalar_lea.vmem [#allocation11], %s1483_s8  ;;  %s1515_s18 = int_to_ptr.vmem [resolvable:$true] %s593_s18 }
  0x6a   : > { %s609_s20 = sshll.u32 %s377_s11, 4  ;;  %s1513_s25 = scalar_lea.hbm %s1632_s4, %s1505_s7  ;;  %s1523_s20 = int_to_ptr.vmem [resolvable:$true] %s609_s20 }
  0x6b   : > { %s1667_s1 = sld [smem:[#allocation25_spill]]  ;;  %s567_s13 = scalar_lea.sflag [#allocation4], %s1480_s21 }
  0x6c   : > { %866 = vmatpush3.bf16.msra.mxu0 %v1012_v3  ;;  %874 = vmatpush3.bf16.msra.mxu1 %v1013_v4  ;;  %s1122_s14 = scalar_lea.vmem %s1515_s18, 64  ;;  %s1292_s16 = smov [#allocation10]  }
  0x6d   : > { %879 = vmatprep.subr.bf16.mxu0 %v1290_v0  ;;  %p1123_p9 = scmp.ne.s32.totalorder %s1515_s18, %s1122_s14  ;;  %s1126_s2 = sshll.u32 %s1292_s16, 4  ;;  %s1127_s2 = int_to_ptr.vmem [resolvable:$false] %s1126_s2 }
  0x6e   : > { %s1128_s5 = scalar_lea.vmem %s1127_s2, 128  ;;  %p1129_p4 = scmp.lt.s32.totalorder %s1515_s18, %s1127_s2 }
  0x6f   : > { %868 = vmatmul.mubr.msk.bf16.vlgmr.msra.gmra.mxu0 %vm403_vm1, %v386_v5  ;;  %876 = vmatmul.mubr.msk.bf16.vlgmr.msra.gmra.mxu1 %vm403_vm1, %v386_v5  ;;  %p1124_p12 = pnand %p1123_p9, %p1443_p0  ;;  %p1130_p6 = scmp.lt.s32.totalorder %s1128_s5, %s1122_s14 }
  0x70   : > { %880 = vmatpush3.bf16.msra.mxu0 %v1014_v6  ;;  %883 = vmatprep.mubr.msk.bf16.mxu0 %vm1291_vm0, %v1290_v0 }
  0x71   : > { %881 = vmatprep.subr.bf16.mxu0 %v1290_v0  ;;  %s1521_s30 = scalar_lea.hbm %s1667_s1, %s1505_s7  ;;  %p1125_p2 = pneg %p1124_p12 }
  0x72   : > { %p1131_p11 = por %p1130_p6, %p1129_p4 }
  0x74   : > { %882 = vmatpush3.bf16.msra.mxu0 %v1015_v7  ;;  %p1132_p13 = pnand %p1131_p11, %p1125_p2 }
  0x77   : > { %884 = vmatmul.mubr.msk.bf16.vlgmr.msra.gmra.mxu0 %vm403_vm1, %v386_v5 }
 0x12f   : > { %v441_v8 = vpop.f32.mrf.mxu0  ;;  %v500_v10 = vpop.f32.mrf.mxu1 }
 0x130   : > { %v447_v9 = vpack.c.bf16 %v441_v8, %v441_v8  ;;  %v506_v12 = vpack.c.bf16 %v500_v10, %v500_v10 }
 0x131   : > { %v869_v11 = vpop.f32.mrf.mxu0  ;;  %v877_v13 = vpop.f32.mrf.mxu1 }
 0x132   : > { %449 = vst.msk [vmem:[%s370_s9] sm:$0xf] %vm448_vm2, %v447_v9  ;;  %507 = vst.msk [vmem:[%s377_s11] sm:$0xf] %vm448_vm2, %v506_v12 }
 0x133   : > { %v444_v14 = vpop.f32.mrf.mxu0 }
 0x134   : > { %1135 = shalt.err (!%p1132_p13)
}
 0x135   : > { %s1136_s9 = scalar_lea.hbm %s1513_s25, 64  ;;  %s1140_s10 = scalar_lea.hbm %s1632_s4, 256 }
 0x136   : > { %p1137_p3 = scmp.ne.s32.totalorder %s1513_s25, %s1136_s9  ;;  %p1141_p8 = scmp.lt.s32.totalorder %s1513_s25, %s1632_s4 }
 0x137   : > { %p1142_p7 = scmp.lt.s32.totalorder %s1140_s10, %s1136_s9 }
 0x138   : > { %p1138_p10 = pnand %p1137_p3, %p1443_p0 }
 0x139   : > { %p1143_p1 = por %p1142_p7, %p1141_p8 }
 0x13a   : > { %p1139_p5 = pneg %p1138_p10 }
 0x13c   : > { %p1144_p9 = pnand %p1143_p1, %p1139_p5 }
 0x13e   : > { %1147 = shalt.err (!%p1144_p9)
}
 0x13f   : > { %901 = dma.vmem_to_hbm [thread:$0]  (%p1443_p0), %s1515_s18, 64, %s1513_s25, %s567_s13   ;;  %v503_v15 = vpop.f32.mrf.mxu1 }
 0x140   : > { %s1550_s19 = scalar_lea.sflag [#allocation12], %s571_s6  ;;  %s1148_s14 = scalar_lea.vmem %s1523_s20, 64 }
 0x141   : > { %p1149_p12 = scmp.ne.s32.totalorder %s1523_s20, %s1148_s14  ;;  %s1293_s16 = smov [#allocation11]  }
 0x142   : > { %s1152_s2 = sshll.u32 %s1293_s16, 4  ;;  %s1153_s2 = int_to_ptr.vmem [resolvable:$false] %s1152_s2 }
 0x143   : > { %p1150_p2 = pnand %p1149_p12, %p1443_p0  ;;  %s1154_s5 = scalar_lea.vmem %s1153_s2, 128 }
 0x144   : > { %p1155_p6 = scmp.lt.s32.totalorder %s1523_s20, %s1153_s2  ;;  %p1156_p11 = scmp.lt.s32.totalorder %s1154_s5, %s1148_s14 }
 0x145   : > { %p1151_p4 = pneg %p1150_p2 }
 0x146   : > { %p1157_p13 = por %p1156_p11, %p1155_p6 }
 0x148   : > { %p1158_p3 = pnand %p1157_p13, %p1151_p4 }
 0x14a   : > { %1161 = shalt.err (!%p1158_p3)
}
 0x14b   : > { %s1162_s29 = scalar_lea.hbm %s1521_s30, 64  ;;  %s1166_s25 = scalar_lea.hbm %s1667_s1, 256 }
 0x14c   : > { %p1163_p10 = scmp.ne.s32.totalorder %s1521_s30, %s1162_s29  ;;  %p1167_p7 = scmp.lt.s32.totalorder %s1521_s30, %s1667_s1 }
 0x14d   : > { %p1168_p1 = scmp.lt.s32.totalorder %s1166_s25, %s1162_s29 }
 0x14e   : > { %p1164_p5 = pnand %p1163_p10, %p1443_p0 }
 0x14f   : > { %p1169_p9 = por %p1168_p1, %p1167_p7 }
 0x150   : > { %p1165_p8 = pneg %p1164_p5 }
 0x152   : > { %p1170_p12 = pnand %p1169_p9, %p1165_p8 }
 0x154   : > { %1173 = shalt.err (!%p1170_p12)
}
 0x155   : > { %902 = dma.vmem_to_hbm [thread:$0]  (%p1443_p0), %s1523_s20, 64, %s1521_s30, %s1550_s19   ;;  %v870_v16 = vpop.f32.mrf.mxu0  ;;  %v878_v17 = vpop.f32.mrf.mxu1 }
 0x156   : > { %s384_s21 = scalar_lea.vmem [#allocation13], %s1483_s8  ;;  %s1668_s24 = sld [smem:[#allocation26_spill]] }
 0x157   : > { %s625_s11 = sshll.u32 %s384_s21, 4  ;;  %v558_v18 = vpop.f32.mrf.mxu0  ;;  %s1294_s8 = smov [#allocation13]   ;;  %s626_s11 = int_to_ptr.vmem [resolvable:$true] %s625_s11 }
 0x158   : > { %v564_v19 = vpack.c.bf16 %v558_v18, %v558_v18  ;;  %s1174_s2 = scalar_lea.vmem %s626_s11, 64  ;;  %s1178_s20 = sshll.u32 %s1294_s8, 4  ;;  %s1179_s20 = int_to_ptr.vmem [resolvable:$false] %s1178_s20 }
 0x159   : > { %v885_v20 = vpop.f32.mrf.mxu0  ;;  %p1175_p2 = scmp.ne.s32.totalorder %s626_s11, %s1174_s2  ;;  %s1180_s30 = scalar_lea.vmem %s1179_s20, 128 }
 0x15a   : > { %565 = vst.msk [vmem:[%s384_s21] sm:$0xf] %vm448_vm2, %v564_v19  ;;  %p1181_p11 = scmp.lt.s32.totalorder %s626_s11, %s1179_s20  ;;  %p1182_p13 = scmp.lt.s32.totalorder %s1180_s30, %s1174_s2 }
 0x15b   : > { %v561_v21 = vpop.f32.mrf.mxu0  ;;  %p1176_p4 = pnand %p1175_p2, %p1443_p0 }
 0x15c   : > { %s1669_s14 = smov %s1668_s24  ;;  %s1578_s16 = scalar_lea.hbm %s1668_s24, %s1505_s7 }
 0x15d   : > { %p1177_p6 = pneg %p1176_p4  ;;  %p1183_p3 = por %p1182_p13, %p1181_p11 }
 0x15f   : > { %p1184_p10 = pnand %p1183_p3, %p1177_p6 }
 0x161   : > { %1187 = shalt.err (!%p1184_p10)
}
 0x162   : > { %s1188_s7 = scalar_lea.hbm %s1578_s16, 64  ;;  %s1192_s6 = scalar_lea.hbm %s1669_s14, 256 }
 0x163   : > { %p1189_p5 = scmp.ne.s32.totalorder %s1578_s16, %s1188_s7  ;;  %p1193_p1 = scmp.lt.s32.totalorder %s1578_s16, %s1669_s14 }
 0x164   : > { %p1194_p9 = scmp.lt.s32.totalorder %s1192_s6, %s1188_s7 }
 0x165   : > { %p1190_p8 = pnand %p1189_p5, %p1443_p0 }
 0x166   : > { %p1195_p12 = por %p1194_p9, %p1193_p1 }
 0x167   : > { %p1191_p7 = pneg %p1190_p8 }
 0x169   : > { %p1196_p2 = pnand %p1195_p12, %p1191_p7 }
 0x16b   : > { %1199 = shalt.err (!%p1196_p2)
}
 0x16c   : > { %903 = dma.vmem_to_hbm [thread:$0]  (%p1443_p0), %s626_s11, 64, %s1578_s16, %s1550_s19   ;;  %v886_v22 = vpop.f32.mrf.mxu0 }
 0x16d PF: > { %s1670_s13 = sld [smem:[#allocation19_spill]]  ;;  %p938_p4 = scmp.ge.s32.totalorder %s1282_s28, 2 }
 0x16e   : > { %s1671_s9 = sld [smem:[#allocation20_spill]] }
 0x173   : > { %s637_s21 = sand.u32 1, %s1670_s13  }
 0x174   : > { %p1672_p6 = scmp.ne.s32.totalorder %s1671_s9, 0  ;;  %s638_s10 = scalar_lea.sflag [#allocation4], %s637_s21 }
 0x176   : > { %p922_p11 = pnand %p938_p4, %p1672_p6 }
 0x178   : > { %p923_p13 = pneg %p922_p11 }
 0x17a   : > { %1245 = dma.done.wait (%p923_p13), %s638_s10, 64  }
 0x17b   : > { %1247 = vsyncadd (%p923_p13), %s638_s10, 4294967232  ;;  %s1673_s15 = sadd.s32 4294967294, %s1282_s28  }
 0x17c   : > { %s646_s24 = sand.u32 1, %s1673_s15  }
 0x17d   : > { %s647_s17 = scalar_lea.sflag [#allocation12], %s646_s24 }
 0x17e   : > { %1249 = dma.done.wait (%p923_p13), %s647_s17, 128  }
 0x17f   : > { %1251 = vsyncadd (%p923_p13), %s647_s17, 4294967168  ;;  %s28_s28 = sadd.s32 1, %s1282_s28   ;;  %s1674_s19 = sld [smem:[#allocation21_spill]] }
 0x180   : > { %p25_p0 = scmp.ge.s32.totalorder %s28_s28, 6   ;;  %s1675_s21 = smov %s1258_s22 }
 0x181   : > { %s1676_s22 = smov %s1262_s23  ;;  %s1677_s23 = smov %s1460_s3 }
 0x182   : > { %s1678_s24 = smov %s1274_s26  ;;  %s1679_s25 = smov %s1278_s27 }
 0x183   : > { %s1681_s27 = smov %s1687_s12  ;;  %27 = sbr.rel (!%p25_p0) target bundleno = 17 (0x11), region = 128 }
 0x185   : > { %s1680_s26 = smov %s1674_s19 }
 0x188   :  { %661 = vsyncpa [#allocation3], 1 }
 0x189   :  { %663 = vsyncpa [#allocation3 + $0x1], 1 }
 0x18a   :  { %664 = vsyncpa [#allocation6], 1 }
 0x18b   :  { %665 = vsyncpa [#allocation9], 1 }
 0x18c   :  { %666 = vsyncpa [#allocation4], 1 }
 0x18d   :  { %668 = vsyncpa [#allocation4 + $0x1], 1 }
 0x18e   :  { %669 = vsyncpa [#allocation12], 1 }
 0x18f   :  { %671 = vsyncpa [#allocation12 + $0x1], 1 }

</bundles_post_ra>
